<compile_context>
chip_gen: v7x
topology: tpu7x:2x2x1
jax: 0.10.0
libtpu: 0.0.40
codegen_flags: <defaults>
</compile_context>

<pallas_src>
import functools
import math

import jax
import jax.numpy as jnp
import numpy as np
from jax.experimental import pallas as pl
from jax.experimental.pallas import tpu as pltpu


def _attn_kernel(x_ref, wqkv_ref, wp_ref, bqkv_ref, bp_ref,
                 y_ref, k_out_ref, v_out_ref,
                 q_sc, k_sc, v_sc,
                 *, n_head: int, tq: int, n_q: int, compute_dtype):
    """Grid = (batch, q_tile). x_ref block = full sequence of one batch element."""
    qi = pl.program_id(1)
    T, C = x_ref.shape[1], x_ref.shape[2]
    H = n_head
    D = C // H
    scale = 1.0 / math.sqrt(D)

    # ---- once per batch element: fused QKV projection (one wide MXU matmul) --
    @pl.when(qi == 0)
    def _project_qkv():
        x = x_ref[0]                                                  # [T, C] bf16
        qkv = jnp.dot(x, wqkv_ref[...],
                      preferred_element_type=jnp.float32) + bqkv_ref[0]   # [T, 3C] f32
        k_f32 = qkv[:, C:2 * C]
        v_f32 = qkv[:, 2 * C:]
        # present cache: one lane-dense [T, C] store per tensor (unmasked vst);
        # the [B, H, T, D] view is produced by the JAX wrapper.
        k_out_ref[0] = k_f32.astype(k_out_ref.dtype)
        v_out_ref[0] = v_f32.astype(v_out_ref.dtype)
        # Head-major bf16 scratch for the batched attention einsums; q is
        # pre-scaled so the score matmul needs no per-step multiply.  This head
        # split runs once per batch element (not once per q tile / score block).
        q_c = (qkv[:, :C] * scale).astype(compute_dtype)
        k_c = k_f32.astype(compute_dtype)
        v_c = v_f32.astype(compute_dtype)
        for h in range(H):
            q_sc[h] = q_c[:, h * D:(h + 1) * D]
            k_sc[h] = k_c[:, h * D:(h + 1) * D]
            v_sc[h] = v_c[:, h * D:(h + 1) * D]

    # ---- per q-tile: attention, batched over heads ---------------------------
    if n_q == 1:
        qh = q_sc[...]                                                # [H, T, D]
    else:
        row0 = pl.multiple_of(qi * tq, tq)
        qh = q_sc[:, pl.ds(row0, tq), :]                              # [H, tq, D]
    kh = k_sc[...]                                                    # [H, T, D]
    vh = v_sc[...]                                                    # [H, T, D]

    s = jnp.einsum('hqd,hkd->hqk', qh, kh,
                   preferred_element_type=jnp.float32)                # [H, tq, T]

    # Causal mask built in-kernel (no [T, T] mask DMA / VMEM).
    rows = jax.lax.broadcasted_iota(jnp.int32, (H, tq, T), 1) + qi * tq
    cols = jax.lax.broadcasted_iota(jnp.int32, (H, tq, T), 2)
    s = jnp.where(rows >= cols, s, jnp.float32(-1e30))

    m = jnp.max(s, axis=-1, keepdims=True)
    p = jnp.exp(s - m)
    denom = jnp.sum(p, axis=-1, keepdims=True)
    p = p * pl.reciprocal(denom, approx=True)                         # EUP vrcp

    ctx = jnp.einsum('hqk,hkd->hqd', p.astype(compute_dtype), vh,
                     preferred_element_type=jnp.float32)              # [H, tq, D]

    # Output projection accumulated per head (no concatenate of head outputs).
    acc = None
    for h in range(H):
        part = jnp.dot(ctx[h].astype(compute_dtype), wp_ref[h],
                       preferred_element_type=jnp.float32)            # [tq, C]
        acc = part if acc is None else acc + part
    y = acc + bp_ref[0]
    y_ref[0] = y.astype(y_ref.dtype)


def _vmem_limit_bytes(T, C, H, D, tq, compute_dtype):
    """Rough upper bound on the kernel's per-core VMEM footprint.
    Documents the v7x 64 MiB ceiling; clamped to [16 MiB, 64 MiB]."""
    wb = jnp.dtype(compute_dtype).itemsize
    sub = lambda n: -(-n // 8) * 8
    lane = lambda n: -(-n // 128) * 128
    est = 0
    est += 2 * sub(T) * lane(C) * wb            # x block (compute dtype), double buffered
    est += 2 * sub(C) * lane(3 * C) * wb        # fused Wqkv (grid-invariant, still 2-buffered)
    est += 2 * H * sub(D) * lane(C) * wb        # Wp [H, D, C]
    est += 2 * 8 * (lane(3 * C) + lane(C)) * 4  # biases (f32, sublane padded)
    est += 2 * sub(tq) * lane(C) * 4            # y output tile
    est += 2 * 2 * sub(T) * lane(C) * 4         # present k / v outputs (resident)
    est += 3 * H * sub(T) * lane(D) * wb        # q / k / v head-major scratch
    est += sub(T) * lane(3 * C) * 4             # f32 qkv intermediate
    est += 4 * H * sub(tq) * lane(T) * 4        # scores / softmax intermediates
    est = int(est * 1.5) + (4 << 20)            # headroom for Mosaic temporaries
    return max(16 << 20, min(est, 64 << 20))


def causal_self_attention(x, attn_mask, params, n_head, *,
                          q_block=128, compute_dtype=jnp.bfloat16):
    """x: [B, T, C]; attn_mask accepted for API parity (the causal mask is
    regenerated in-kernel).  params = (wq, wk, wv, wp, bq, bk, bv, bp) with
    weights stored [in, out] and biases [1, C].  Returns (y, present) where
    present = stack((k, v)) of shape [2, B, H, T, D], like the PyTorch module."""
    del attn_mask  # kernel assumes the standard causal mask (see TODOs above)
    B, T, C = x.shape
    assert C % n_head == 0
    D = C // n_head

    wq, wk, wv, wp, bq, bk, bv, bp = params
    # Fused QKV weight/bias; output-projection weight reshaped head-major so the
    # kernel indexes it per head with no lane slicing.  Weights are cast to the
    # MXU compute dtype (bf16); biases stay f32 (added after f32 accumulation).
    wqkv = jnp.concatenate([wq, wk, wv], axis=1).astype(compute_dtype)    # [C, 3C]
    bqkv = jnp.concatenate([bq, bk, bv], axis=1).astype(jnp.float32)      # [1, 3C]
    wp_r = wp.reshape(n_head, D, C).astype(compute_dtype)                 # [H, D, C]
    bp_r = bp.astype(jnp.float32)                                         # [1, C]
    x_c = x.astype(compute_dtype)

    tq = T if T <= q_block else q_block
    assert T % tq == 0, "sequence length must be a multiple of the q tile"
    n_q = T // tq

    kernel = functools.partial(_attn_kernel, n_head=n_head, tq=tq, n_q=n_q,
                               compute_dtype=compute_dtype)
    inv2 = lambda b, q: (0, 0)
    inv3 = lambda b, q: (0, 0, 0)

    y, k_btc, v_btc = pl.pallas_call(
        kernel,
        out_shape=(
            jax.ShapeDtypeStruct((B, T, C), x.dtype),
            jax.ShapeDtypeStruct((B, T, C), x.dtype),
            jax.ShapeDtypeStruct((B, T, C), x.dtype),
        ),
        grid_spec=pltpu.PrefetchScalarGridSpec(
            num_scalar_prefetch=0,
            grid=(B, n_q),
            in_specs=[
                pl.BlockSpec((1, T, C), lambda b, q: (b, 0, 0)),    # x (full seq of batch b)
                # NOTE: the next four operands are grid-invariant; pipeline_mode
                # pl.Buffered(1) would halve their VMEM (left at the default
                # double-buffering for portability across jax versions).
                pl.BlockSpec((C, 3 * C), inv2),                     # fused Wqkv (bf16)
                pl.BlockSpec((n_head, D, C), inv3),                 # Wp, head-major (bf16)
                pl.BlockSpec((1, 3 * C), inv2),                     # fused qkv bias (f32)
                pl.BlockSpec((1, C), inv2),                         # proj bias (f32)
            ],
            out_specs=[
                pl.BlockSpec((1, tq, C), lambda b, q: (b, q, 0)),   # y tile (lane-dense)
                pl.BlockSpec((1, T, C), lambda b, q: (b, 0, 0)),    # present k (lane-dense)
                pl.BlockSpec((1, T, C), lambda b, q: (b, 0, 0)),    # present v (lane-dense)
            ],
            scratch_shapes=[
                pltpu.VMEM((n_head, T, D), compute_dtype),          # q (pre-scaled)
                pltpu.VMEM((n_head, T, D), compute_dtype),          # k
                pltpu.VMEM((n_head, T, D), compute_dtype),          # v
            ],
        ),
        compiler_params=pltpu.CompilerParams(
            dimension_semantics=("parallel", "arbitrary"),
            vmem_limit_bytes=_vmem_limit_bytes(T, C, n_head, D, tq, compute_dtype),
        ),
    )(x_c, wqkv, wp_r, bqkv, bp_r)

    # [B, T, C] -> [B, H, T, D]: layout plumbing done by XLA in the wrapper so
    # the kernel only does lane-dense stores.
    def to_heads(z):
        return z.reshape(B, T, n_head, D).transpose(0, 2, 1, 3)

    present = jnp.stack((to_heads(k_btc), to_heads(v_btc)))         # [2, B, H, T, D]
    return y, present


def _reference(x, attn_mask, params, n_head):
    """Plain-JAX f32 reference mirroring the PyTorch fallback path (dropout=0)."""
    wq, wk, wv, wp, bq, bk, bv, bp = params
    B, T, C = x.shape
    D = C // n_head
    mask = attn_mask[:, :, :T, :T]

    def heads(z):
        return (z.reshape(B, T, n_head, D)).transpose(0, 2, 1, 3)

    q = heads(x @ wq + bq[0])
    k = heads(x @ wk + bk[0])
    v = heads(x @ wv + bv[0])
    att = jnp.einsum("bhtd,bhsd->bhts", q, k) / math.sqrt(D)
    att = jnp.where(mask == 0, -jnp.inf, att)
    att = jax.nn.softmax(att, axis=-1)
    y = jnp.einsum("bhts,bhsd->bhtd", att, v)
    y = y.transpose(0, 2, 1, 3).reshape(B, T, C)
    y = y @ wp + bp[0]
    return y, jnp.stack((k, v))


if __name__ == "__main__":
    # Small config: B=2, T=8, C=32 (n_embd), H=4 heads -> head_dim=8.
    B, T, C, H = 2, 8, 32, 4

    key = jax.random.PRNGKey(0)
    keys = jax.random.split(key, 10)
    scale = 0.02
    wq = scale * jax.random.normal(keys[0], (C, C), jnp.float32)
    wk = scale * jax.random.normal(keys[1], (C, C), jnp.float32)
    wv = scale * jax.random.normal(keys[2], (C, C), jnp.float32)
    wp = scale * jax.random.normal(keys[3], (C, C), jnp.float32)
    bq = scale * jax.random.normal(keys[4], (1, C), jnp.float32)
    bk = scale * jax.random.normal(keys[5], (1, C), jnp.float32)
    bv = scale * jax.random.normal(keys[6], (1, C), jnp.float32)
    bp = scale * jax.random.normal(keys[7], (1, C), jnp.float32)
    params = (wq, wk, wv, wp, bq, bk, bv, bp)

    x = jax.random.normal(keys[8], (B, T, C), jnp.float32)
    # Causal mask buffer [1, 1, Tmax, Tmax] (like minGPT's registered buffer).
    attn_mask = jnp.tril(jnp.ones((T, T), jnp.float32))[None, None]

    y, present = causal_self_attention(x, attn_mask, params, H)
    y = jax.block_until_ready(y)
    present = jax.block_until_ready(present)

    y_ref, present_ref = _reference(x, attn_mask, params, H)
    # bf16 MXU operands (f32 accumulation) + approx reciprocal -> compare to the
    # f32 reference with bf16-level tolerances.
    np.testing.assert_allclose(np.asarray(y), np.asarray(y_ref), atol=3e-3, rtol=3e-2)
    np.testing.assert_allclose(np.asarray(present), np.asarray(present_ref),
                               atol=3e-3, rtol=3e-2)

    print("KERNEL_OK")
</pallas_src>

<mosaic_0001>
module attributes {stable_mosaic.version = 11 : i64} {
  func.func @_attn_kernel(%arg0: i32, %arg1: i32, %arg2: memref<1x8x32xbf16, #tpu.memory_space<vmem>>, %arg3: memref<32x96xbf16, #tpu.memory_space<vmem>>, %arg4: memref<4x8x32xbf16, #tpu.memory_space<vmem>>, %arg5: memref<1x96xf32, #tpu.memory_space<vmem>>, %arg6: memref<1x32xf32, #tpu.memory_space<vmem>>, %arg7: memref<1x8x32xf32, #tpu.memory_space<vmem>>, %arg8: memref<1x8x32xf32, #tpu.memory_space<vmem>>, %arg9: memref<1x8x32xf32, #tpu.memory_space<vmem>>, %arg10: memref<4x8x8xbf16, #tpu.memory_space<vmem>>, %arg11: memref<4x8x8xbf16, #tpu.memory_space<vmem>>, %arg12: memref<4x8x8xbf16, #tpu.memory_space<vmem>>) attributes {dimension_semantics = [#tpu.dimension_semantics<parallel>, #tpu.dimension_semantics<arbitrary>], iteration_bounds = array<i64: 2, 1>, scalar_prefetch = 0 : i64, scratch_operands = 3 : i64, tpu.core_type = #tpu.core_type<tc>, window_params = [{transform_indices = @transform_0, window_bounds = array<i64: 1, 8, 32>}, {pipeline_mode = #tpu.pipeline_mode<synchronous>, transform_indices = @transform_1, window_bounds = array<i64: 32, 96>}, {pipeline_mode = #tpu.pipeline_mode<synchronous>, transform_indices = @transform_2, window_bounds = array<i64: 4, 8, 32>}, {pipeline_mode = #tpu.pipeline_mode<synchronous>, transform_indices = @transform_3, window_bounds = array<i64: 1, 96>}, {pipeline_mode = #tpu.pipeline_mode<synchronous>, transform_indices = @transform_4, window_bounds = array<i64: 1, 32>}, {transform_indices = @transform_5, window_bounds = array<i64: 1, 8, 32>}, {transform_indices = @transform_6, window_bounds = array<i64: 1, 8, 32>}, {transform_indices = @transform_7, window_bounds = array<i64: 1, 8, 32>}]} {
    %c0_i32 = arith.constant 0 : i32
    %0 = arith.cmpi eq, %arg1, %c0_i32 : i32
    %1 = arith.extui %0 : i1 to i32
    %c0_i32_0 = arith.constant 0 : i32
    %2 = arith.cmpi ne, %1, %c0_i32_0 : i32
    scf.if %2 {
      %c0_31 = arith.constant 0 : index
      %c0_32 = arith.constant 0 : index
      %c0_33 = arith.constant 0 : index
      %62 = vector.load %arg2[%c0_31, %c0_32, %c0_33] : memref<1x8x32xbf16, #tpu.memory_space<vmem>>, vector<1x8x32xbf16>
      %63 = vector.shape_cast %62 : vector<1x8x32xbf16> to vector<8x32xbf16>
      %c0_34 = arith.constant 0 : index
      %c0_35 = arith.constant 0 : index
      %64 = vector.load %arg3[%c0_34, %c0_35] : memref<32x96xbf16, #tpu.memory_space<vmem>>, vector<32x96xbf16>
      %cst_36 = arith.constant dense<0.000000e+00> : vector<8x96xf32>
      %65 = tpu.matmul %63, %64, %cst_36 {dimension_numbers = #tpu.dot_dimension_numbers<[1], [0], [0], [1], [0, 0, 1, 1], [], []>} : vector<8x32xbf16>, vector<32x96xbf16>, vector<8x96xf32> -> vector<8x96xf32>
      %c0_37 = arith.constant 0 : index
      %c0_38 = arith.constant 0 : index
      %66 = vector.load %arg5[%c0_37, %c0_38] : memref<1x96xf32, #tpu.memory_space<vmem>>, vector<1x96xf32>
      %67 = vector.shape_cast %66 : vector<1x96xf32> to vector<96xf32>
      %68 = vector.shape_cast %67 : vector<96xf32> to vector<1x96xf32>
      %69 = vector.broadcast %68 : vector<1x96xf32> to vector<8x96xf32>
      %70 = arith.addf %65, %69 : vector<8x96xf32>
      %71 = vector.extract_strided_slice %70 {offsets = [0, 32], sizes = [8, 32], strides = [1, 1]} : vector<8x96xf32> to vector<8x32xf32>
      %72 = vector.extract_strided_slice %70 {offsets = [0, 64], sizes = [8, 32], strides = [1, 1]} : vector<8x96xf32> to vector<8x32xf32>
      %c0_39 = arith.constant 0 : index
      %c0_40 = arith.constant 0 : index
      %c0_41 = arith.constant 0 : index
      %73 = vector.load %arg8[%c0_39, %c0_40, %c0_41] : memref<1x8x32xf32, #tpu.memory_space<vmem>>, vector<1x8x32xf32>
      %74 = vector.shape_cast %73 : vector<1x8x32xf32> to vector<8x32xf32>
      %75 = vector.shape_cast %71 : vector<8x32xf32> to vector<1x8x32xf32>
      tpu.vector_store %arg8[%c0_39, %c0_40, %c0_41], %75 {strides = array<i32>} : memref<1x8x32xf32, #tpu.memory_space<vmem>>, vector<1x8x32xf32>,
      %c0_42 = arith.constant 0 : index
      %c0_43 = arith.constant 0 : index
      %c0_44 = arith.constant 0 : index
      %76 = vector.load %arg9[%c0_42, %c0_43, %c0_44] : memref<1x8x32xf32, #tpu.memory_space<vmem>>, vector<1x8x32xf32>
      %77 = vector.shape_cast %76 : vector<1x8x32xf32> to vector<8x32xf32>
      %78 = vector.shape_cast %72 : vector<8x32xf32> to vector<1x8x32xf32>
      tpu.vector_store %arg9[%c0_42, %c0_43, %c0_44], %78 {strides = array<i32>} : memref<1x8x32xf32, #tpu.memory_space<vmem>>, vector<1x8x32xf32>,
      %79 = vector.extract_strided_slice %70 {offsets = [0, 0], sizes = [8, 32], strides = [1, 1]} : vector<8x96xf32> to vector<8x32xf32>
      %cst_45 = arith.constant 0.353553385 : f32
      %80 = vector.broadcast %cst_45 : f32 to vector<8x32xf32>
      %81 = arith.mulf %79, %80 : vector<8x32xf32>
      %82 = arith.truncf %81 : vector<8x32xf32> to vector<8x32xbf16>
      %83 = arith.truncf %71 : vector<8x32xf32> to vector<8x32xbf16>
      %84 = arith.truncf %72 : vector<8x32xf32> to vector<8x32xbf16>
      %85 = vector.extract_strided_slice %82 {offsets = [0, 0], sizes = [8, 8], strides = [1, 1]} : vector<8x32xbf16> to vector<8x8xbf16>
      %c0_46 = arith.constant 0 : index
      %c0_47 = arith.constant 0 : index
      %c0_48 = arith.constant 0 : index
      %86 = vector.load %arg10[%c0_46, %c0_47, %c0_48] : memref<4x8x8xbf16, #tpu.memory_space<vmem>>, vector<1x8x8xbf16>
      %87 = vector.shape_cast %86 : vector<1x8x8xbf16> to vector<8x8xbf16>
      %88 = vector.shape_cast %85 : vector<8x8xbf16> to vector<1x8x8xbf16>
      tpu.vector_store %arg10[%c0_46, %c0_47, %c0_48], %88 {strides = array<i32>} : memref<4x8x8xbf16, #tpu.memory_space<vmem>>, vector<1x8x8xbf16>,
      %89 = vector.extract_strided_slice %83 {offsets = [0, 0], sizes = [8, 8], strides = [1, 1]} : vector<8x32xbf16> to vector<8x8xbf16>
      %c0_49 = arith.constant 0 : index
      %c0_50 = arith.constant 0 : index
      %c0_51 = arith.constant 0 : index
      %90 = vector.load %arg11[%c0_49, %c0_50, %c0_51] : memref<4x8x8xbf16, #tpu.memory_space<vmem>>, vector<1x8x8xbf16>
      %91 = vector.shape_cast %90 : vector<1x8x8xbf16> to vector<8x8xbf16>
      %92 = vector.shape_cast %89 : vector<8x8xbf16> to vector<1x8x8xbf16>
      tpu.vector_store %arg11[%c0_49, %c0_50, %c0_51], %92 {strides = array<i32>} : memref<4x8x8xbf16, #tpu.memory_space<vmem>>, vector<1x8x8xbf16>,
      %93 = vector.extract_strided_slice %84 {offsets = [0, 0], sizes = [8, 8], strides = [1, 1]} : vector<8x32xbf16> to vector<8x8xbf16>
      %c0_52 = arith.constant 0 : index
      %c0_53 = arith.constant 0 : index
      %c0_54 = arith.constant 0 : index
      %94 = vector.load %arg12[%c0_52, %c0_53, %c0_54] : memref<4x8x8xbf16, #tpu.memory_space<vmem>>, vector<1x8x8xbf16>
      %95 = vector.shape_cast %94 : vector<1x8x8xbf16> to vector<8x8xbf16>
      %96 = vector.shape_cast %93 : vector<8x8xbf16> to vector<1x8x8xbf16>
      tpu.vector_store %arg12[%c0_52, %c0_53, %c0_54], %96 {strides = array<i32>} : memref<4x8x8xbf16, #tpu.memory_space<vmem>>, vector<1x8x8xbf16>,
      %97 = vector.extract_strided_slice %82 {offsets = [0, 8], sizes = [8, 8], strides = [1, 1]} : vector<8x32xbf16> to vector<8x8xbf16>
      %c1_55 = arith.constant 1 : index
      %c0_56 = arith.constant 0 : index
      %c0_57 = arith.constant 0 : index
      %98 = vector.load %arg10[%c1_55, %c0_56, %c0_57] : memref<4x8x8xbf16, #tpu.memory_space<vmem>>, vector<1x8x8xbf16>
      %99 = vector.shape_cast %98 : vector<1x8x8xbf16> to vector<8x8xbf16>
      %100 = vector.shape_cast %97 : vector<8x8xbf16> to vector<1x8x8xbf16>
      tpu.vector_store %arg10[%c1_55, %c0_56, %c0_57], %100 {strides = array<i32>} : memref<4x8x8xbf16, #tpu.memory_space<vmem>>, vector<1x8x8xbf16>,
      %101 = vector.extract_strided_slice %83 {offsets = [0, 8], sizes = [8, 8], strides = [1, 1]} : vector<8x32xbf16> to vector<8x8xbf16>
      %c1_58 = arith.constant 1 : index
      %c0_59 = arith.constant 0 : index
      %c0_60 = arith.constant 0 : index
      %102 = vector.load %arg11[%c1_58, %c0_59, %c0_60] : memref<4x8x8xbf16, #tpu.memory_space<vmem>>, vector<1x8x8xbf16>
      %103 = vector.shape_cast %102 : vector<1x8x8xbf16> to vector<8x8xbf16>
      %104 = vector.shape_cast %101 : vector<8x8xbf16> to vector<1x8x8xbf16>
      tpu.vector_store %arg11[%c1_58, %c0_59, %c0_60], %104 {strides = array<i32>} : memref<4x8x8xbf16, #tpu.memory_space<vmem>>, vector<1x8x8xbf16>,
      %105 = vector.extract_strided_slice %84 {offsets = [0, 8], sizes = [8, 8], strides = [1, 1]} : vector<8x32xbf16> to vector<8x8xbf16>
      %c1_61 = arith.constant 1 : index
      %c0_62 = arith.constant 0 : index
      %c0_63 = arith.constant 0 : index
      %106 = vector.load %arg12[%c1_61, %c0_62, %c0_63] : memref<4x8x8xbf16, #tpu.memory_space<vmem>>, vector<1x8x8xbf16>
      %107 = vector.shape_cast %106 : vector<1x8x8xbf16> to vector<8x8xbf16>
      %108 = vector.shape_cast %105 : vector<8x8xbf16> to vector<1x8x8xbf16>
      tpu.vector_store %arg12[%c1_61, %c0_62, %c0_63], %108 {strides = array<i32>} : memref<4x8x8xbf16, #tpu.memory_space<vmem>>, vector<1x8x8xbf16>,
      %109 = vector.extract_strided_slice %82 {offsets = [0, 16], sizes = [8, 8], strides = [1, 1]} : vector<8x32xbf16> to vector<8x8xbf16>
      %c2_64 = arith.constant 2 : index
      %c0_65 = arith.constant 0 : index
      %c0_66 = arith.constant 0 : index
      %110 = vector.load %arg10[%c2_64, %c0_65, %c0_66] : memref<4x8x8xbf16, #tpu.memory_space<vmem>>, vector<1x8x8xbf16>
      %111 = vector.shape_cast %110 : vector<1x8x8xbf16> to vector<8x8xbf16>
      %112 = vector.shape_cast %109 : vector<8x8xbf16> to vector<1x8x8xbf16>
      tpu.vector_store %arg10[%c2_64, %c0_65, %c0_66], %112 {strides = array<i32>} : memref<4x8x8xbf16, #tpu.memory_space<vmem>>, vector<1x8x8xbf16>,
      %113 = vector.extract_strided_slice %83 {offsets = [0, 16], sizes = [8, 8], strides = [1, 1]} : vector<8x32xbf16> to vector<8x8xbf16>
      %c2_67 = arith.constant 2 : index
      %c0_68 = arith.constant 0 : index
      %c0_69 = arith.constant 0 : index
      %114 = vector.load %arg11[%c2_67, %c0_68, %c0_69] : memref<4x8x8xbf16, #tpu.memory_space<vmem>>, vector<1x8x8xbf16>
      %115 = vector.shape_cast %114 : vector<1x8x8xbf16> to vector<8x8xbf16>
      %116 = vector.shape_cast %113 : vector<8x8xbf16> to vector<1x8x8xbf16>
      tpu.vector_store %arg11[%c2_67, %c0_68, %c0_69], %116 {strides = array<i32>} : memref<4x8x8xbf16, #tpu.memory_space<vmem>>, vector<1x8x8xbf16>,
      %117 = vector.extract_strided_slice %84 {offsets = [0, 16], sizes = [8, 8], strides = [1, 1]} : vector<8x32xbf16> to vector<8x8xbf16>
      %c2_70 = arith.constant 2 : index
      %c0_71 = arith.constant 0 : index
      %c0_72 = arith.constant 0 : index
      %118 = vector.load %arg12[%c2_70, %c0_71, %c0_72] : memref<4x8x8xbf16, #tpu.memory_space<vmem>>, vector<1x8x8xbf16>
      %119 = vector.shape_cast %118 : vector<1x8x8xbf16> to vector<8x8xbf16>
      %120 = vector.shape_cast %117 : vector<8x8xbf16> to vector<1x8x8xbf16>
      tpu.vector_store %arg12[%c2_70, %c0_71, %c0_72], %120 {strides = array<i32>} : memref<4x8x8xbf16, #tpu.memory_space<vmem>>, vector<1x8x8xbf16>,
      %121 = vector.extract_strided_slice %82 {offsets = [0, 24], sizes = [8, 8], strides = [1, 1]} : vector<8x32xbf16> to vector<8x8xbf16>
      %c3_73 = arith.constant 3 : index
      %c0_74 = arith.constant 0 : index
      %c0_75 = arith.constant 0 : index
      %122 = vector.load %arg10[%c3_73, %c0_74, %c0_75] : memref<4x8x8xbf16, #tpu.memory_space<vmem>>, vector<1x8x8xbf16>
      %123 = vector.shape_cast %122 : vector<1x8x8xbf16> to vector<8x8xbf16>
      %124 = vector.shape_cast %121 : vector<8x8xbf16> to vector<1x8x8xbf16>
      tpu.vector_store %arg10[%c3_73, %c0_74, %c0_75], %124 {strides = array<i32>} : memref<4x8x8xbf16, #tpu.memory_space<vmem>>, vector<1x8x8xbf16>,
      %125 = vector.extract_strided_slice %83 {offsets = [0, 24], sizes = [8, 8], strides = [1, 1]} : vector<8x32xbf16> to vector<8x8xbf16>
      %c3_76 = arith.constant 3 : index
      %c0_77 = arith.constant 0 : index
      %c0_78 = arith.constant 0 : index
      %126 = vector.load %arg11[%c3_76, %c0_77, %c0_78] : memref<4x8x8xbf16, #tpu.memory_space<vmem>>, vector<1x8x8xbf16>
      %127 = vector.shape_cast %126 : vector<1x8x8xbf16> to vector<8x8xbf16>
      %128 = vector.shape_cast %125 : vector<8x8xbf16> to vector<1x8x8xbf16>
      tpu.vector_store %arg11[%c3_76, %c0_77, %c0_78], %128 {strides = array<i32>} : memref<4x8x8xbf16, #tpu.memory_space<vmem>>, vector<1x8x8xbf16>,
      %129 = vector.extract_strided_slice %84 {offsets = [0, 24], sizes = [8, 8], strides = [1, 1]} : vector<8x32xbf16> to vector<8x8xbf16>
      %c3_79 = arith.constant 3 : index
      %c0_80 = arith.constant 0 : index
      %c0_81 = arith.constant 0 : index
      %130 = vector.load %arg12[%c3_79, %c0_80, %c0_81] : memref<4x8x8xbf16, #tpu.memory_space<vmem>>, vector<1x8x8xbf16>
      %131 = vector.shape_cast %130 : vector<1x8x8xbf16> to vector<8x8xbf16>
      %132 = vector.shape_cast %129 : vector<8x8xbf16> to vector<1x8x8xbf16>
      tpu.vector_store %arg12[%c3_79, %c0_80, %c0_81], %132 {strides = array<i32>} : memref<4x8x8xbf16, #tpu.memory_space<vmem>>, vector<1x8x8xbf16>,
    } else {
    }
    %c0 = arith.constant 0 : index
    %c0_1 = arith.constant 0 : index
    %c0_2 = arith.constant 0 : index
    %3 = vector.load %arg10[%c0, %c0_1, %c0_2] : memref<4x8x8xbf16, #tpu.memory_space<vmem>>, vector<4x8x8xbf16>
    %c0_3 = arith.constant 0 : index
    %c0_4 = arith.constant 0 : index
    %c0_5 = arith.constant 0 : index
    %4 = vector.load %arg11[%c0_3, %c0_4, %c0_5] : memref<4x8x8xbf16, #tpu.memory_space<vmem>>, vector<4x8x8xbf16>
    %c0_6 = arith.constant 0 : index
    %c0_7 = arith.constant 0 : index
    %c0_8 = arith.constant 0 : index
    %5 = vector.load %arg12[%c0_6, %c0_7, %c0_8] : memref<4x8x8xbf16, #tpu.memory_space<vmem>>, vector<4x8x8xbf16>
    "tpu.trace_start"() <{level = 10 : i32, message = "hqd,hkd->hqk"}> : () -> ()
    %cst = arith.constant dense<0.000000e+00> : vector<4x8x8xf32>
    %6 = tpu.matmul %3, %4, %cst {dimension_numbers = #tpu.dot_dimension_numbers<[2], [2], [1], [1], [0, 0, 0, 1, 1, 1], [0], [0]>} : vector<4x8x8xbf16>, vector<4x8x8xbf16>, vector<4x8x8xf32> -> vector<4x8x8xf32>
    "tpu.trace_stop"() : () -> ()
    %7 = tpu.iota {dimensions = array<i32: 1>} : vector<4x8x8xi32>
    %c8_i32 = arith.constant 8 : i32
    %8 = arith.muli %arg1, %c8_i32 : i32
    %9 = vector.broadcast %8 : i32 to vector<4x8x8xi32>
    %10 = arith.addi %7, %9 : vector<4x8x8xi32>
    %11 = tpu.iota {dimensions = array<i32: 2>} : vector<4x8x8xi32>
    %12 = arith.cmpi sge, %10, %11 : vector<4x8x8xi32>
    %cst_9 = arith.constant -1.000000e+30 : f32
    %13 = vector.broadcast %cst_9 : f32 to vector<4x8x8xf32>
    %14 = arith.select %12, %6, %13 : vector<4x8x8xi1>, vector<4x8x8xf32>
    %cst_10 = arith.constant dense<0xFF800000> : vector<4x8xf32>
    %15 = vector.multi_reduction <maximumf>, %14, %cst_10 [2] : vector<4x8x8xf32> to vector<4x8xf32>
    %16 = vector.shape_cast %15 : vector<4x8xf32> to vector<4x8x1xf32>
    %17 = vector.broadcast %16 : vector<4x8x1xf32> to vector<4x8x8xf32>
    %18 = arith.subf %14, %17 : vector<4x8x8xf32>
    %19 = math.exp %18 : vector<4x8x8xf32>
    %cst_11 = arith.constant dense<0.000000e+00> : vector<4x8xf32>
    %20 = vector.multi_reduction <add>, %19, %cst_11 [2] : vector<4x8x8xf32> to vector<4x8xf32>
    %21 = vector.shape_cast %20 : vector<4x8xf32> to vector<4x8x1xf32>
    %22 = tpu.reciprocal %21 {approx = true} : vector<4x8x1xf32> -> vector<4x8x1xf32>
    %23 = vector.broadcast %22 : vector<4x8x1xf32> to vector<4x8x8xf32>
    %24 = arith.mulf %19, %23 : vector<4x8x8xf32>
    %25 = arith.truncf %24 : vector<4x8x8xf32> to vector<4x8x8xbf16>
    "tpu.trace_start"() <{level = 10 : i32, message = "hqk,hkd->hqd"}> : () -> ()
    %cst_12 = arith.constant dense<0.000000e+00> : vector<4x8x8xf32>
    %26 = tpu.matmul %25, %5, %cst_12 {dimension_numbers = #tpu.dot_dimension_numbers<[2], [1], [1], [2], [0, 0, 0, 1, 1, 2], [0], [0]>} : vector<4x8x8xbf16>, vector<4x8x8xbf16>, vector<4x8x8xf32> -> vector<4x8x8xf32>
    "tpu.trace_stop"() : () -> ()
    %27 = vector.extract_strided_slice %26 {offsets = [0, 0, 0], sizes = [1, 8, 8], strides = [1, 1, 1]} : vector<4x8x8xf32> to vector<1x8x8xf32>
    %28 = vector.shape_cast %27 : vector<1x8x8xf32> to vector<8x8xf32>
    %29 = arith.truncf %28 : vector<8x8xf32> to vector<8x8xbf16>
    %c0_13 = arith.constant 0 : index
    %c0_14 = arith.constant 0 : index
    %c0_15 = arith.constant 0 : index
    %30 = vector.load %arg4[%c0_13, %c0_14, %c0_15] : memref<4x8x32xbf16, #tpu.memory_space<vmem>>, vector<1x8x32xbf16>
    %31 = vector.shape_cast %30 : vector<1x8x32xbf16> to vector<8x32xbf16>
    %cst_16 = arith.constant dense<0.000000e+00> : vector<8x32xf32>
    %32 = tpu.matmul %29, %31, %cst_16 {dimension_numbers = #tpu.dot_dimension_numbers<[1], [0], [0], [1], [0, 0, 1, 1], [], []>} : vector<8x8xbf16>, vector<8x32xbf16>, vector<8x32xf32> -> vector<8x32xf32>
    %33 = vector.extract_strided_slice %26 {offsets = [1, 0, 0], sizes = [1, 8, 8], strides = [1, 1, 1]} : vector<4x8x8xf32> to vector<1x8x8xf32>
    %34 = vector.shape_cast %33 : vector<1x8x8xf32> to vector<8x8xf32>
    %35 = arith.truncf %34 : vector<8x8xf32> to vector<8x8xbf16>
    %c1 = arith.constant 1 : index
    %c0_17 = arith.constant 0 : index
    %c0_18 = arith.constant 0 : index
    %36 = vector.load %arg4[%c1, %c0_17, %c0_18] : memref<4x8x32xbf16, #tpu.memory_space<vmem>>, vector<1x8x32xbf16>
    %37 = vector.shape_cast %36 : vector<1x8x32xbf16> to vector<8x32xbf16>
    %cst_19 = arith.constant dense<0.000000e+00> : vector<8x32xf32>
    %38 = tpu.matmul %35, %37, %cst_19 {dimension_numbers = #tpu.dot_dimension_numbers<[1], [0], [0], [1], [0, 0, 1, 1], [], []>} : vector<8x8xbf16>, vector<8x32xbf16>, vector<8x32xf32> -> vector<8x32xf32>
    %39 = arith.addf %32, %38 : vector<8x32xf32>
    %40 = vector.extract_strided_slice %26 {offsets = [2, 0, 0], sizes = [1, 8, 8], strides = [1, 1, 1]} : vector<4x8x8xf32> to vector<1x8x8xf32>
    %41 = vector.shape_cast %40 : vector<1x8x8xf32> to vector<8x8xf32>
    %42 = arith.truncf %41 : vector<8x8xf32> to vector<8x8xbf16>
    %c2 = arith.constant 2 : index
    %c0_20 = arith.constant 0 : index
    %c0_21 = arith.constant 0 : index
    %43 = vector.load %arg4[%c2, %c0_20, %c0_21] : memref<4x8x32xbf16, #tpu.memory_space<vmem>>, vector<1x8x32xbf16>
    %44 = vector.shape_cast %43 : vector<1x8x32xbf16> to vector<8x32xbf16>
    %cst_22 = arith.constant dense<0.000000e+00> : vector<8x32xf32>
    %45 = tpu.matmul %42, %44, %cst_22 {dimension_numbers = #tpu.dot_dimension_numbers<[1], [0], [0], [1], [0, 0, 1, 1], [], []>} : vector<8x8xbf16>, vector<8x32xbf16>, vector<8x32xf32> -> vector<8x32xf32>
    %46 = arith.addf %39, %45 : vector<8x32xf32>
    %47 = vector.extract_strided_slice %26 {offsets = [3, 0, 0], sizes = [1, 8, 8], strides = [1, 1, 1]} : vector<4x8x8xf32> to vector<1x8x8xf32>
    %48 = vector.shape_cast %47 : vector<1x8x8xf32> to vector<8x8xf32>
    %49 = arith.truncf %48 : vector<8x8xf32> to vector<8x8xbf16>
    %c3 = arith.constant 3 : index
    %c0_23 = arith.constant 0 : index
    %c0_24 = arith.constant 0 : index
    %50 = vector.load %arg4[%c3, %c0_23, %c0_24] : memref<4x8x32xbf16, #tpu.memory_space<vmem>>, vector<1x8x32xbf16>
    %51 = vector.shape_cast %50 : vector<1x8x32xbf16> to vector<8x32xbf16>
    %cst_25 = arith.constant dense<0.000000e+00> : vector<8x32xf32>
    %52 = tpu.matmul %49, %51, %cst_25 {dimension_numbers = #tpu.dot_dimension_numbers<[1], [0], [0], [1], [0, 0, 1, 1], [], []>} : vector<8x8xbf16>, vector<8x32xbf16>, vector<8x32xf32> -> vector<8x32xf32>
    %53 = arith.addf %46, %52 : vector<8x32xf32>
    %c0_26 = arith.constant 0 : index
    %c0_27 = arith.constant 0 : index
    %54 = vector.load %arg6[%c0_26, %c0_27] : memref<1x32xf32, #tpu.memory_space<vmem>>, vector<1x32xf32>
    %55 = vector.shape_cast %54 : vector<1x32xf32> to vector<32xf32>
    %56 = vector.shape_cast %55 : vector<32xf32> to vector<1x32xf32>
    %57 = vector.broadcast %56 : vector<1x32xf32> to vector<8x32xf32>
    %58 = arith.addf %53, %57 : vector<8x32xf32>
    %c0_28 = arith.constant 0 : index
    %c0_29 = arith.constant 0 : index
    %c0_30 = arith.constant 0 : index
    %59 = vector.load %arg7[%c0_28, %c0_29, %c0_30] : memref<1x8x32xf32, #tpu.memory_space<vmem>>, vector<1x8x32xf32>
    %60 = vector.shape_cast %59 : vector<1x8x32xf32> to vector<8x32xf32>
    %61 = vector.shape_cast %58 : vector<8x32xf32> to vector<1x8x32xf32>
    tpu.vector_store %arg7[%c0_28, %c0_29, %c0_30], %61 {strides = array<i32>} : memref<1x8x32xf32, #tpu.memory_space<vmem>>, vector<1x8x32xf32>,
    return
  }
  func.func @transform_0(%arg0: i32, %arg1: i32) -> (i32, i32, i32) {
    %c0_i32 = arith.constant 0 : i32
    %c0_i32_0 = arith.constant 0 : i32
    %c0_i32_1 = arith.constant 0 : i32
    return %arg0, %c0_i32, %c0_i32_0 : i32, i32, i32
  }
  func.func @transform_1(%arg0: i32, %arg1: i32) -> (i32, i32) {
    %c0_i32 = arith.constant 0 : i32
    %c0_i32_0 = arith.constant 0 : i32
    %c0_i32_1 = arith.constant 0 : i32
    return %c0_i32, %c0_i32_0 : i32, i32
  }
  func.func @transform_2(%arg0: i32, %arg1: i32) -> (i32, i32, i32) {
    %c0_i32 = arith.constant 0 : i32
    %c0_i32_0 = arith.constant 0 : i32
    %c0_i32_1 = arith.constant 0 : i32
    %c0_i32_2 = arith.constant 0 : i32
    return %c0_i32, %c0_i32_0, %c0_i32_1 : i32, i32, i32
  }
  func.func @transform_3(%arg0: i32, %arg1: i32) -> (i32, i32) {
    %c0_i32 = arith.constant 0 : i32
    %c0_i32_0 = arith.constant 0 : i32
    %c0_i32_1 = arith.constant 0 : i32
    return %c0_i32, %c0_i32_0 : i32, i32
  }
  func.func @transform_4(%arg0: i32, %arg1: i32) -> (i32, i32) {
    %c0_i32 = arith.constant 0 : i32
    %c0_i32_0 = arith.constant 0 : i32
    %c0_i32_1 = arith.constant 0 : i32
    return %c0_i32, %c0_i32_0 : i32, i32
  }
  func.func @transform_5(%arg0: i32, %arg1: i32) -> (i32, i32, i32) {
    %c0_i32 = arith.constant 0 : i32
    %c0_i32_0 = arith.constant 0 : i32
    return %arg0, %arg1, %c0_i32 : i32, i32, i32
  }
  func.func @transform_6(%arg0: i32, %arg1: i32) -> (i32, i32, i32) {
    %c0_i32 = arith.constant 0 : i32
    %c0_i32_0 = arith.constant 0 : i32
    %c0_i32_1 = arith.constant 0 : i32
    return %arg0, %c0_i32, %c0_i32_0 : i32, i32, i32
  }
  func.func @transform_7(%arg0: i32, %arg1: i32) -> (i32, i32, i32) {
    %c0_i32 = arith.constant 0 : i32
    %c0_i32_0 = arith.constant 0 : i32
    %c0_i32_1 = arith.constant 0 : i32
    return %arg0, %c0_i32, %c0_i32_0 : i32, i32, i32
  }
}

</mosaic_0001>

<bundles_post_ra>
// kernel: tpu_custom_call.1
= control target key start
LH: loop header
LB: loop body
LE: loop exit
PB: predicated region body
PF: predicated region fallthrough
CT: control target
= control target key end

     0   :  { %s2365_s0 = inlined_call_operand.hbm [shape: bf16[2,8,32], index: 0, kind: input, shape index: {}]   ;;  %s2366_s1 = inlined_call_operand.hbm [shape: bf16[32,96], index: 1, kind: input, shape index: {}]   ;;  %s2367_s2 = inlined_call_operand.hbm [shape: bf16[4,8,32], index: 2, kind: input, shape index: {}]   ;;  %s2368_s3 = inlined_call_operand.vmem [shape: f32[1,96], index: 3, kind: input, shape index: {}]   ;;  %s2369_s4 = inlined_call_operand.vmem [shape: f32[1,32], index: 4, kind: input, shape index: {}]   ;;  %s2370_s5 = inlined_call_operand.hbm [shape: f32[2,8,32], index: 5, kind: output, shape index: {0}]   ;;  %s2371_s6 = inlined_call_operand.hbm [shape: f32[2,8,32], index: 6, kind: output, shape index: {1}]   ;;  %s2372_s7 = inlined_call_operand.hbm [shape: f32[2,8,32], index: 7, kind: output, shape index: {2}]  }
   0x1   :  { %2378 = sst [smem:[#allocation20_spill]] %s2365_s0 }
   0x2   :  { %13 = vsyncpa [#allocation6], 0 }
   0x3   :  { %15 = vsyncpa [#allocation6 + $0x1], 0 }
   0x4   :  { %16 = vsyncpa [#allocation9], 0 }
   0x5   :  { %17 = vsyncpa [#allocation7], 0 }
   0x6   :  { %19 = vsyncpa [#allocation7 + $0x1], 0 }
   0x7   :  { %20 = vsyncpa [#allocation13], 0 }
   0x8   :  { %22 = vsyncpa [#allocation13 + $0x1], 0  ;;  %s1932_s24 = smov 0   ;;  %s1934_s25 = smov 0  }
   0x9   :  { %s1936_s26 = smov 0   ;;  %s1938_s27 = smov 0  }
   0xa   :  { %s1940_s28 = smov 0   ;;  %s1942_s29 = smov 0  }
   0xb LB: > { %s1963_s30 = sadd.s32 4294967295, %s1869_s29   ;;  %s2374_s8 = sadd.s32 4294967294, %s1869_s29   ;;  %s1869_s29 = sphi %s1942_s29, %s28_s29   ;;  %s1865_s28 = sphi %s1940_s28, %s2400_s28   ;;  %s1861_s27 = sphi %s1938_s27, %s2399_s27   ;;  %s1857_s26 = sphi %s1936_s26, %s2398_s26   ;;  %s1853_s25 = sphi %s1934_s25, %s2397_s25   ;;  %s1849_s24 = sphi %s1932_s24, %s2396_s24  }
   0xc   : > { %p60_p0 = scmp.ne.s32.totalorder %s1853_s25, %s1849_s24  ;;  %p2373_p1 = scmp.eq.s32.totalorder %s1963_s30, 0 }
   0xd   : > { %p176_p3 = scmp.eq.s32.totalorder %s2374_s8, 1  ;;  %p1362_p5 = scmp.ge.s32.totalorder %s1869_s29, 1 }
   0xe   : > { %p1974_p4 = por %p2373_p1, %p60_p0  ;;  %p235_p7 = scmp.lt.s32.totalorder %s1869_s29, 3 }
   0xf   : > { %p1979_p6 = por %p176_p3, %p60_p0  ;;  %s1871_s12 = smov [#allocation8]  }
  0x10   : > { %s2379_s9 = scalar_select %p1974_p4, 1, 0 }
  0x11   : > { %s2380_s10 = scalar_select %p1979_p6, 1, 0 }
  0x12   : > { %p1984_p8 = pnand %p1362_p5, %p235_p7  ;;  %s247_s13 = sshll.u32 %s1871_s12, 4  ;;  %s1988_s13 = int_to_ptr.vmem [resolvable:$true] %s247_s13 }
  0x13   : > { %2381 = sst [smem:[#allocation19_spill]] %s2380_s10  ;;  %s1872_s15 = smov [#allocation10]  }
  0x14   : > { %p1527_p9 = pneg %p1984_p8  ;;  %s260_s16 = sshll.u32 %s1872_s15, 4  ;;  %s1999_s16 = int_to_ptr.vmem [resolvable:$true] %s260_s16 }
  0x15   : > { %s1637_s19 = scalar_lea.hbm %s2366_s1, 256 }
  0x16   : > { %p1995_p11 = pnand %p1527_p9, %p2373_p1  ;;  %p1638_p12 = scmp.ne.s32.totalorder %s2366_s1, %s1637_s19 }
  0x17   : > { %p1644_p5 = scmp.lt.u32.totalorder %s1637_s19, %s2366_s1 }
  0x18   : > { %p1639_p13 = pneg %p1995_p11 }
  0x1a   : > { %p1640_p0 = pnand %p1639_p13, %p1638_p12 }
  0x1c   : > { %p1641_p3 = pneg %p1640_p0 }
  0x1e   : > { %p1646_p7 = pnand %p1644_p5, %p1641_p3 }
  0x20   : > { %1649 = shalt.err (!%p1646_p7)
}
  0x21   : > { %s1650_s12 = scalar_lea.vmem %s1988_s13, 256  ;;  %p1658_p2 = scmp.lt.s32.totalorder %s1988_s13, %s1988_s13 }
  0x22   : > { %p1651_p9 = scmp.ne.s32.totalorder %s1988_s13, %s1650_s12  ;;  %p1659_p12 = scmp.lt.s32.totalorder %s1650_s12, %s1650_s12 }
  0x24   : > { %p1653_p10 = pnand %p1651_p9, %p1639_p13  ;;  %p1660_p0 = por %p1659_p12, %p1658_p2 }
  0x26   : > { %p1654_p1 = pneg %p1653_p10 }
  0x28   : > { %p1661_p6 = pnand %p1660_p0, %p1654_p1 }
  0x2a   : > { %1664 = shalt.err (!%p1661_p6)
}
  0x2b   : > { %s1873_s15 = smov 64   ;;  %s1874_s17 = smov 4  }
  0x2c   : > { %1530 = dma.hbm_to_vmem [thread:$0]  (!%p1995_p11), %s2366_s1, 256, %s1988_s13, [#allocation9], %s1873_s15, %s1873_s15, %s1874_s17  }
  0x2d   : > { %s1665_s22 = scalar_lea.hbm %s2367_s2, 256 }
  0x2e   : > { %p1666_p2 = scmp.ne.s32.totalorder %s2367_s2, %s1665_s22  ;;  %p1672_p10 = scmp.lt.u32.totalorder %s1665_s22, %s2367_s2 }
  0x30   : > { %p1668_p1 = pnand %p1666_p2, %p1639_p13 }
  0x32   : > { %p1669_p6 = pneg %p1668_p1 }
  0x34   : > { %p1674_p3 = pnand %p1672_p10, %p1669_p6 }
  0x36   : > { %1677 = shalt.err (!%p1674_p3)
}
  0x37   : > { %s1678_s13 = scalar_lea.vmem %s1999_s16, 256  ;;  %p1686_p12 = scmp.lt.s32.totalorder %s1999_s16, %s1999_s16 }
  0x38   : > { %p1679_p5 = scmp.ne.s32.totalorder %s1999_s16, %s1678_s13  ;;  %p1687_p0 = scmp.lt.s32.totalorder %s1678_s13, %s1678_s13 }
  0x3a   : > { %p1681_p7 = pnand %p1679_p5, %p1639_p13  ;;  %p1688_p2 = por %p1687_p0, %p1686_p12 }
  0x3c   : > { %p1682_p9 = pneg %p1681_p7 }
  0x3e   : > { %p1689_p1 = pnand %p1688_p2, %p1682_p9 }
  0x40   : > { %1692 = shalt.err (!%p1689_p1)
}
  0x41   : > { %1533 = dma.hbm_to_vmem [thread:$0]  (!%p1995_p11), %s2367_s2, 256, %s1999_s16, [#allocation9], %s1873_s15, %s1873_s15, %s1874_s17  }
  0x42   : > { %s40_s18 = sadd.s32 1, %s1865_s28  ;;  %s47_s19 = sadd.s32 1, %s1857_s26 }
  0x43   : > { %p42_p13 = scmp.ge.s32.totalorder %s40_s18, 2  ;;  %p54_p6 = scmp.ne.s32.totalorder %s1857_s26, %s1853_s25 }
  0x44   : > { %p55_p10 = scmp.eq.s32.totalorder %s1869_s29, 0  ;;  %p1550_p3 = scmp.lt.s32.totalorder %s1869_s29, 2 }
  0x45   : > { %s2402_s18 = smov (%p42_p13, %s40_s18), 0  ;;  %p2384_p7 = scmp.eq.s32.totalorder %s1963_s30, 1 }
  0x46   : > { %p56_p5 = por %p55_p10, %p54_p6  ;;  %s44_s20 = ssub.s32 %s1865_s28, %s2402_s18 }
  0x47   : > { %p2063_p9 = por %p2384_p7, %p54_p6  ;;  %s280_s21 = sand.u32 1, %s1857_s26  }
  0x48   : > { %p45_p12 = scmp.eq.s32.totalorder %s44_s20, 0  ;;  %s1366_s16 = sshll.u32 %s280_s21, 2 }
  0x49   : > { %s2385_s14 = scalar_select %p2063_p9, 1, 0 }
  0x4a   : > { %s1367_s15 = sshll.u32 %s1865_s28, 6  ;;  %s2386_s0 = sld [smem:[#allocation20_spill]] }
  0x4b   : > { %s2072_s17 = scalar_select %p45_p12, %s1857_s26, %s47_s19  }
  0x4c   : > { %s284_s13 = scalar_lea.vmem [#allocation5], %s1366_s16  ;;  %p2081_p11 = pnand %p1550_p3, %p56_p5 }
  0x4d   : > { %s291_s8 = sshll.u32 %s284_s13, 4  ;;  %s281_s19 = scalar_lea.sflag [#allocation6], %s280_s21  ;;  %s2085_s8 = int_to_ptr.vmem [resolvable:$true] %s291_s8 }
  0x4e   : > { %p1695_p2 = pneg %p2081_p11 }
  0x50   : > { %s2077_s12 = scalar_lea.hbm %s2386_s0, %s1367_s15  ;;  %s1698_s22 = scalar_lea.hbm %s2386_s0, 128 }
  0x51   : > { %s1693_s20 = scalar_lea.hbm %s2077_s12, 64  ;;  %p1699_p6 = scmp.lt.u32.totalorder %s2077_s12, %s2386_s0 }
  0x52   : > { %p1694_p0 = scmp.ne.s32.totalorder %s2077_s12, %s1693_s20  ;;  %p1700_p10 = scmp.lt.u32.totalorder %s1698_s22, %s1693_s20 }
  0x53   : > { %p1702_p5 = scmp.lt.u32.totalorder %s1693_s20, %s2077_s12 }
  0x54   : > { %p1696_p1 = pnand %p1695_p2, %p1694_p0  ;;  %p1701_p3 = por %p1700_p10, %p1699_p6 }
  0x56   : > { %p1697_p13 = pneg %p1696_p1  ;;  %p1703_p7 = por %p1702_p5, %p1701_p3 }
  0x58   : > { %p1704_p12 = pnand %p1703_p7, %p1697_p13 }
  0x5a   : > { %1707 = shalt.err (!%p1704_p12)
}
  0x5b   : > { %s1708_s21 = scalar_lea.vmem %s2085_s8, 64  ;;  %s1875_s16 = smov [#allocation5]  }
  0x5c   : > { %p1709_p0 = scmp.ne.s32.totalorder %s2085_s8, %s1708_s21  ;;  %s1713_s15 = sshll.u32 %s1875_s16, 4  ;;  %s1714_s15 = int_to_ptr.vmem [resolvable:$false] %s1713_s15 }
  0x5d   : > { %s1715_s23 = scalar_lea.vmem %s1714_s15, 128  ;;  %p1716_p4 = scmp.lt.s32.totalorder %s2085_s8, %s1714_s15 }
  0x5e   : > { %p1711_p1 = pnand %p1709_p0, %p1695_p2  ;;  %p1717_p6 = scmp.lt.s32.totalorder %s1715_s23, %s1708_s21 }
  0x60   : > { %p1712_p9 = pneg %p1711_p1  ;;  %p1718_p10 = por %p1717_p6, %p1716_p4 }
  0x62   : > { %p1719_p3 = pnand %p1718_p10, %p1712_p9 }
  0x64   : > { %1722 = shalt.err (!%p1719_p3)
}
  0x65   : > { %1537 = dma.hbm_to_vmem [thread:$0]  (!%p2081_p11), %s2077_s12, 64, %s2085_s8, %s281_s19  }
  0x66   : > { %300 = sbr.rel (%p1984_p8) target bundleno = 1459 (0x5b3), region = 40  ;;  %s2115_s20 = sand.u32 (!%p1984_p8), 1, %s1853_s25  }
  0x67   : > { %s1369_s22 = sshll.u32 (!%p1984_p8), %s2115_s20, 2  ;;  %s303_s13 = scalar_lea.sflag (!%p1984_p8), [#allocation6], %s2115_s20 }
  0x68   : > { %s306_s21 = scalar_lea.vmem (!%p1984_p8), [#allocation5], %s1369_s22  ;;  %p2388_p4 = scmp.ne.s32.totalorder (!%p1984_p8), %s2379_s9, 0 }
  0x6d   : > { %1832 = dma.done.wait (%p2388_p4), %s303_s13, 64  }
  0x6e   : > { %1834 = vsyncadd (%p2388_p4), %s303_s13, 4294967232  ;;  %p2389_p9 = scmp.eq.s32.totalorder %s1963_s30, 0 }
  0x70   : > { %1836 = dma.done.wait (%p2389_p9), [#allocation9], 512   ;;  %p2390_p11 = pmov %p2389_p9 }
  0x71   : > { %v1876_v0 = vmov 0.0   ;;  %vm1877_vm0 = vmmov 0   ;;  %v1619_v1 = vld [vmem:[#allocation8] sm:$0xff]   ;;  %v1620_v2 = vld [vmem:[#allocation8 + $0x8] sm:$0xff]   ;;  %v360_v3 = vld [vmem:[%s306_s21] sm:$0xf]  ;;  %v698_v32 = vlaneseq }
  0x72   : > { %1838 = vsyncadd (%p2390_p11), [#allocation9], 4294966784  ;;  %1431 = vmatprep.subr.bf16.mxu0 %v1876_v0  ;;  %1435 = vmatprep.mubr.msk.bf16.mxu0 %vm1877_vm0, %v1876_v0  ;;  %vm384_vm1 = vcmask 261120   ;;  %v1375_v4 = vld [vmem:[%s2368_s3] ss:$0 sm:$0xff]  ;;  %vm440_vm2 = vcmask 60416  }
  0x73   : > { %1439 = vmatprep.subr.bf16.mxu1 %v1876_v0  ;;  %1441 = vmatprep.mubr.msk.bf16.mxu1 %vm1877_vm0, %v1876_v0  ;;  %s1878_s12 = smov 96   ;;  %s1879_s8 = smov 120   ;;  %vm513_vm3 = vcmask 64512   ;;  %v699_v33 = vshrl.u32 %v698_v32, 7  ;;  %v704_v34 = vand.u32 127, %v698_v32  ;;  %vm761_vm5 = vcmask 1043456  }
  0x74   : > { %1432 = vmatpush3.bf16.msra.mxu0 %v1619_v1  ;;  %s1880_s10 = smov 88   ;;  %s1881_s19 = smov 80  }
  0x75   : > { %1433 = vmatprep.subr.bf16.mxu0 %v1876_v0  ;;  %s1882_s16 = smov 72   ;;  %s1883_s15 = smov 112   ;;  %vm705_vm4 = vcmp.ge.s32.totalorder %v699_v33, %v704_v34 }
  0x76   : > { %s1884_s23 = smov 104   ;;  %s1885_s22 = smov 56  }
  0x77   : > { %s1886_s13 = smov 64   ;;  %s1887_s21 = smov 48  }
  0x78   : > { %1434 = vmatpush3.bf16.msra.mxu0 %v1620_v2  ;;  %s1888_s9 = smov 40   ;;  %s2209_s11 = sshll.u32 %s2115_s20, 3 }
  0x79   : > { %1445 = vmatprep.subr.bf16.mxu0 %v1876_v0  ;;  %p2391_p2 = scmp.ne.s32.totalorder %s2385_s14, 0 }
  0x7b   : > { %1436 = vmatmul.mubr.msk.bf16.vlgmr.msra.gmra.mrb[0].mxu0 %vm384_vm1, %v360_v3 }
  0x7c   : > { %1447 = vmatprep.mubr.msk.bf16.mxu0 %vm1877_vm0, %v1876_v0 }
 0x14e   : > { %v422_v5 = vpop.f32.mrb[0].mxu0 }
 0x14f   : > { %v2141_v6 = vadd.f32 %v1375_v4, %v422_v5  ;;  %v1437_v7 = vpop.f32.mrb[1].mxu0 }
 0x150   : > { %v425_v8 = vpop.f32.mrb[2].mxu0 }
 0x151   : > { %v2145_v9 = vpack.c.bf16 %v2141_v6, %v2141_v6  ;;  %v1438_v10 = vpop.f32.mrb[3].mxu0  ;;  %v437_v11 = vmul.f32 0.35355338, %v2141_v6 }
 0x153   : > { %445 = vrot.lane.b32.xlu0 %v2145_v9, %s1878_s12  ;;  %v438_v12 = vpack.c.bf16 %v437_v11, %v437_v11 }
 0x155   : > { %456 = vrot.lane.b32.xlu1 %v438_v12, %s1879_s8  ;;  %441 = vst.msk [vmem:[#allocation2] sm:$0xf] %vm440_vm2, %v438_v12  ;;  %s347_s8 = scalar_lea.vmem [#allocation12], %s2209_s11 }
 0x157   : > { %461 = vrot.lane.b32.xlu0 %v2145_v9, %s1880_s10  ;;  %s1155_s10 = sand.u32 1, %s1963_s30  }
 0x159   : > { %476 = vrot.lane.b32.xlu1 %v2145_v9, %s1881_s19  ;;  %s2253_s19 = sshll.u32 %s1861_s27, 7  ;;  %s1889_s27 = smov [#allocation12]  }
 0x15a   : > { %s1727_s30 = sshll.u32 %s1889_s27, 4  ;;  %s1728_s30 = int_to_ptr.vmem [resolvable:$false] %s1727_s30 }
 0x15b   : > { %491 = vrot.lane.b32.xlu0 %v2145_v9, %s1882_s16  ;;  %s1729_s0 = scalar_lea.vmem %s1728_s30, 256 }
 0x15c   : > { %v501_v25 = vld [vmem:[#allocation2] sm:$0xf] }
 0x15d   : > { %471 = vrot.lane.b32.xlu1 %v438_v12, %s1883_s15 }
 0x15f   : > { %486 = vrot.lane.b32.xlu0 %v438_v12, %s1884_s23  ;;  %s2259_s23 = scalar_lea.hbm %s2371_s6, %s2253_s19 }
 0x1c5   : > { %v446_v13 = vpop.permute.xlu0 %445 }
 0x1c6   : > { %448 = vst.msk [vmem:[#allocation3] sm:$0xf] %vm440_vm2, %v446_v13 }
 0x1c7   : > { %v457_v14 = vpop.permute.xlu1 %456 }
 0x1c8   : > { %460 = vst.msk [vmem:[#allocation2 + $0x4] sm:$0xf] %vm440_vm2, %v457_v14 }
 0x1c9   : > { %v462_v15 = vpop.permute.xlu0 %461 }
 0x1ca   : > { %465 = vst.msk [vmem:[#allocation3 + $0x4] sm:$0xf] %vm440_vm2, %v462_v15 }
 0x1cb   : > { %v477_v16 = vpop.permute.xlu1 %476 }
 0x1cc   : > { %480 = vst.msk [vmem:[#allocation3 + $0x8] sm:$0xf] %vm440_vm2, %v477_v16 }
 0x1cd   : > { %v492_v17 = vpop.permute.xlu0 %491  ;;  %v505_v18 = vld [vmem:[#allocation3] sm:$0xf] }
 0x1ce   : > { %495 = vst.msk [vmem:[#allocation3 + $0xc] sm:$0xf] %vm440_vm2, %v492_v17  ;;  %v518_v19 = vsel %vm513_vm3, %v505_v18, 0 }
 0x1cf   : > { %1440 = vmatpush3.bf16.xpose.msra.mxu1 %v518_v19  ;;  %v472_v20 = vpop.permute.xlu1 %471  ;;  %v502_v28 = vld [vmem:[#allocation2 + $0x4] sm:$0xf] }
 0x1d0   : > { %475 = vst.msk [vmem:[#allocation2 + $0x8] sm:$0xf] %vm440_vm2, %v472_v20  ;;  %1451 = vmatprep.subr.bf16.mxu1 %v1876_v0 }
 0x1d1   : > { %v487_v21 = vpop.permute.xlu0 %486  ;;  %v506_v22 = vld [vmem:[#allocation3 + $0x4] sm:$0xf] }
 0x1d2   : > { %490 = vst.msk [vmem:[#allocation2 + $0xc] sm:$0xf] %vm440_vm2, %v487_v21  ;;  %v564_v23 = vsel %vm513_vm3, %v506_v22, 0 }
 0x1d3   : > { %1446 = vmatpush3.bf16.xpose.msra.mxu0 %v564_v23  ;;  %v507_v24 = vld [vmem:[#allocation3 + $0x8] sm:$0xf] }
 0x1d4   : > { %1457 = vmatprep.subr.bf16.mxu0 %v1876_v0  ;;  %v610_v26 = vsel %vm513_vm3, %v507_v24, 0 }
 0x1d5   : > { %v508_v27 = vld [vmem:[#allocation3 + $0xc] sm:$0xf] }
 0x1d6   : > { %1442 = vmatmul.mubr.msk.bf16.vlgmr.msra.gmra.mrb[0].mxu1 %vm513_vm3, %v501_v25  ;;  %v656_v29 = vsel %vm513_vm3, %v508_v27, 0 }
 0x1d7   : > { %1452 = vmatpush3.bf16.xpose.msra.mxu1 %v610_v26  ;;  %1453 = vmatprep.mubr.msk.bf16.mxu1 %vm1877_vm0, %v1876_v0  ;;  %v503_v30 = vld [vmem:[#allocation2 + $0x8] sm:$0xf] }
 0x1d8   : > { %1463 = vmatprep.subr.bf16.mxu1 %v1876_v0 }
 0x1d9   : > { %v504_v31 = vld [vmem:[#allocation2 + $0xc] sm:$0xf] }
 0x1da   : > { %1448 = vmatmul.mubr.msk.bf16.vlgmr.msra.gmra.mrb[4].mxu0 %vm513_vm3, %v502_v28 }
 0x1db   : > { %1458 = vmatpush3.bf16.xpose.msra.mxu0 %v656_v29  ;;  %1459 = vmatprep.mubr.msk.bf16.mxu0 %vm1877_vm0, %v1876_v0 }
 0x1dc   : > { %1469 = vmatprep.subr.bf16.mxu0 %v1876_v0 }
 0x1de   : > { %1454 = vmatmul.mubr.msk.bf16.vlgmr.msra.gmra.mrb[4].mxu1 %vm513_vm3, %v503_v30 }
 0x1df   : > { %1465 = vmatprep.mubr.msk.bf16.mxu1 %vm1877_vm0, %v1876_v0 }
 0x1e2   : > { %1460 = vmatmul.mubr.msk.bf16.vlgmr.msra.gmra.mrb[8].mxu0 %vm513_vm3, %v504_v31 }
 0x1e3   : > { %1471 = vmatprep.mubr.msk.bf16.mxu0 %vm1877_vm0, %v1876_v0 }
 0x2a9   : > { %v554_v35 = vpop.f32.mrb[0].mxu1 }
 0x2aa   : > { %v706_v36 = vsel %vm705_vm4, %v554_v35, -1e+30  ;;  %v1443_v37 = vpop.f32.mrb[1].mxu1 }
 0x2ab   : > { %v557_v38 = vpop.f32.mrb[2].mxu1  ;;  %v710_v39 = vsel %vm513_vm3, %v706_v36, -inf }
 0x2ac   : > { %711 = vmax.xlane.f32.xlu1 %v710_v39  ;;  %v1444_v40 = vpop.f32.mrb[3].mxu1 }
 0x2ad   : > { %v600_v41 = vpop.f32.mrb[4].mxu0 }
 0x2ae   : > { %v707_v42 = vsel %vm705_vm4, %v600_v41, -1e+30  ;;  %v1449_v43 = vpop.f32.mrb[5].mxu0 }
 0x2af   : > { %v603_v44 = vpop.f32.mrb[6].mxu0  ;;  %v713_v45 = vsel %vm513_vm3, %v707_v42, -inf }
 0x2b0   : > { %714 = vmax.xlane.f32.xlu0 %v713_v45  ;;  %v1450_v46 = vpop.f32.mrb[7].mxu0 }
 0x2b1   : > { %v646_v47 = vpop.f32.mrb[4].mxu1  ;;  %v944_v46 = vld [vmem:[#allocation10] sm:$0xf] }
 0x2b2   : > { %v708_v48 = vsel %vm705_vm4, %v646_v47, -1e+30  ;;  %v1455_v49 = vpop.f32.mrb[5].mxu1  ;;  %v998_v47 = vsel %vm761_vm5, %v944_v46, 0 }
 0x2b3   : > { %v649_v50 = vpop.f32.mrb[6].mxu1  ;;  %v716_v51 = vsel %vm513_vm3, %v708_v48, -inf }
 0x2b4   : > { %v1456_v52 = vpop.f32.mrb[7].mxu1  ;;  %717 = vmax.xlane.f32.xlu0 %v716_v51  ;;  %v1092_v50 = vld [vmem:[#allocation10 + $0xc] sm:$0xf] }
 0x2b5   : > { %v692_v53 = vpop.f32.mrb[8].mxu0 }
 0x2b6   : > { %v709_v54 = vsel %vm705_vm4, %v692_v53, -1e+30  ;;  %v1461_v55 = vpop.f32.mrb[9].mxu0 }
 0x2b7   : > { %v695_v56 = vpop.f32.mrb[10].mxu0  ;;  %v719_v57 = vsel %vm513_vm3, %v709_v54, -inf }
 0x2b8   : > { %720 = vmax.xlane.f32.xlu1 %v719_v57  ;;  %v1462_v58 = vpop.f32.mrb[11].mxu0  ;;  %v1042_v56 = vld [vmem:[#allocation10 + $0x8] sm:$0xf] }
 0x2c9   : > { %466 = vrot.lane.b32.xlu1 %v2145_v9, %s1885_s22  ;;  %s1188_s22 = sshll.u32 %s347_s8, 4  ;;  %s1189_s22 = int_to_ptr.vmem [resolvable:$true] %s1188_s22 }
 0x2ca   : > { %449 = vrot.lane.b32.xlu0 %v2145_v9, %s1886_s13  ;;  %p1730_p7 = scmp.lt.s32.totalorder %s1189_s22, %s1728_s30 }
 0x339   : > { %v712_v59 = vpop.xlane.xlu1 %711 }
 0x33a   : > { %v722_v60 = vsub.f32 %v706_v36, %v712_v59 }
 0x33c   : > { %v726_v61 = vmul.f32 1.442695, %v722_v60 }
 0x33d   : > { %v715_v62 = vpop.xlane.xlu0 %714 }
 0x33e   : > { %1621 = vpow2.f32 %v726_v61  ;;  %v723_v63 = vsub.f32 %v707_v42, %v715_v62  ;;  %v1047_v61 = vsel %vm761_vm5, %v1042_v56, 0 }
 0x340   : > { %v728_v1 = vmul.f32 1.442695, %v723_v63 }
 0x341   : > { %v718_v2 = vpop.xlane.xlu0 %717 }
 0x342   : > { %1623 = vpow2.f32 %v728_v1  ;;  %v724_v3 = vsub.f32 %v708_v48, %v718_v2  ;;  %v947_v48 = vld [vmem:[#allocation10 + $0x4] sm:$0xf] }
 0x343   : > { %v952_v49 = vsel %vm761_vm5, %v947_v48, 0 }
 0x344   : > { %v730_v4 = vmul.f32 1.442695, %v724_v3 }
 0x345   : > { %v450_v5 = vpop.permute.xlu0 %449  ;;  %v721_v7 = vpop.xlane.xlu1 %720 }
 0x346   : > { %1625 = vpow2.f32 %v730_v4  ;;  %452 = vst.msk [vmem:[#allocation4] sm:$0xf] %vm440_vm2, %v450_v5  ;;  %v725_v8 = vsub.f32 %v709_v54, %v721_v7  ;;  %v1097_v54 = vsel %vm761_vm5, %v1092_v50, 0 }
 0x348   : > { %v1622_v10 = vpop.eup %1621  ;;  %v732_v11 = vmul.f32 1.442695, %v725_v8 }
 0x349   : > { %v467_v12 = vpop.permute.xlu1 %466  ;;  %v734_v13 = vsel %vm513_vm3, %v1622_v10, 0.0 }
 0x34a   : > { %1627 = vpow2.f32 %v732_v11  ;;  %470 = vst.msk [vmem:[#allocation4 + $0x4] sm:$0xf] %vm440_vm2, %v467_v12  ;;  %735 = vadd.xlane.f32.xlu0 %v734_v13 }
 0x34c   : > { %v1624_v14 = vpop.eup %1623 }
 0x34d   : > { %v737_v15 = vsel %vm513_vm3, %v1624_v14, 0.0  ;;  %v509_v16 = vld [vmem:[#allocation4] sm:$0xf] }
 0x34e   : > { %738 = vadd.xlane.f32.xlu1 %v737_v15  ;;  %v763_v17 = vsel %vm761_vm5, %v509_v16, 0 }
 0x34f   : > { %1464 = vmatpush3.bf16.msra.mxu1 %v763_v17 }
 0x350   : > { %v1626_v18 = vpop.eup %1625  ;;  %1475 = vmatprep.subr.bf16.mxu1 %v1876_v0 }
 0x351   : > { %v740_v19 = vsel %vm513_vm3, %v1626_v18, 0.0  ;;  %v510_v20 = vld [vmem:[#allocation4 + $0x4] sm:$0xf] }
 0x352   : > { %741 = vadd.xlane.f32.xlu0 %v740_v19  ;;  %v809_v21 = vsel %vm761_vm5, %v510_v20, 0 }
 0x353   : > { %1470 = vmatpush3.bf16.msra.mxu0 %v809_v21 }
 0x354   : > { %v1628_v22 = vpop.eup %1627  ;;  %1481 = vmatprep.subr.bf16.mxu0 %v1876_v0 }
 0x355   : > { %v743_v23 = vsel %vm513_vm3, %v1628_v22, 0.0 }
 0x356   : > { %744 = vadd.xlane.f32.xlu1 %v743_v23 }
 0x367   : > { %481 = vrot.lane.b32.xlu1 %v2145_v9, %s1887_s21  ;;  %s2267_s21 = scalar_lea.sflag [#allocation13], %s1155_s10 }
 0x368   : > { %496 = vrot.lane.b32.xlu0 %v2145_v9, %s1888_s9  ;;  %s1723_s9 = scalar_lea.vmem %s1189_s22, 128 }
 0x369   : > { %p1724_p8 = scmp.ne.s32.totalorder %s1189_s22, %s1723_s9  ;;  %p1731_p12 = scmp.lt.s32.totalorder %s1729_s0, %s1723_s9 }
 0x36b   : > { %429 = vrot.lane.b32.xlu1 %v2141_v6, %s1878_s12  ;;  %s354_s12 = scalar_lea.vmem [#allocation14], %s2209_s11  ;;  %p1725_p13 = pnand %p1724_p8, %p2391_p2 }
 0x36c   : > { %433 = vrot.lane.b32.xlu0 %v2141_v6, %s1886_s13  ;;  %s2265_s13 = sshll.u32 %s354_s12, 4  ;;  %p1732_p0 = por %p1731_p12, %p1730_p7  ;;  %s1202_s13 = int_to_ptr.vmem [resolvable:$true] %s2265_s13 }
 0x36d   : > { %p1726_p5 = pneg %p1725_p13 }
 0x36f   : > { %p1733_p1 = pnand %p1732_p0, %p1726_p5 }
 0x3d7   : > { %v736_v24 = vpop.xlane.xlu0 %735 }
 0x3d8   : > { %1629 = vrcp.f32 %v736_v24 }
 0x3db   : > { %v739_v25 = vpop.xlane.xlu1 %738 }
 0x3dc   : > { %1631 = vrcp.f32 %v739_v25 }
 0x3df   : > { %v742_v26 = vpop.xlane.xlu0 %741 }
 0x3e0   : > { %1633 = vrcp.f32 %v742_v26 }
 0x3e2   : > { %v1630_v27 = vpop.eup %1629 }
 0x3e3   : > { %v750_v28 = vmul.f32 %v1630_v27, %v1622_v10  ;;  %v497_v29 = vpop.permute.xlu0 %496  ;;  %v745_v9 = vpop.xlane.xlu1 %744 }
 0x3e4   : > { %500 = vst.msk [vmem:[#allocation4 + $0xc] sm:$0xf] %vm440_vm2, %v497_v29  ;;  %1635 = vrcp.f32 %v745_v9 }
 0x3e5   : > { %v754_v30 = vpack.c.bf16 %v750_v28, %v750_v28 }
 0x3e6   : > { %v1632_v6 = vpop.eup %1631 }
 0x3e7   : > { %v751_v31 = vmul.f32 %v1632_v6, %v1624_v14  ;;  %1466 = vmatmul.mubr.msk.bf16.vlgmr.msra.gmra.mrb[8].mxu1 %vm513_vm3, %v754_v30  ;;  %v434_v32 = vpop.permute.xlu0 %433  ;;  %v482_v33 = vpop.permute.xlu1 %481 }
 0x3e8   : > { %436 = vst.msk [vmem:[%s354_s12] sm:$0xff] %vm384_vm1, %v434_v32  ;;  %1477 = vmatprep.mubr.msk.bf16.mxu1 %vm1877_vm0, %v1876_v0 }
 0x3e9   : > { %485 = vst.msk [vmem:[#allocation4 + $0x8] sm:$0xf] %vm440_vm2, %v482_v33  ;;  %v755_v34 = vpack.c.bf16 %v751_v31, %v751_v31 }
 0x3ea   : > { %v1634_v35 = vpop.eup %1633 }
 0x3eb   : > { %1472 = vmatmul.mubr.msk.bf16.vlgmr.msra.gmra.mrb[12].mxu0 %vm513_vm3, %v755_v34  ;;  %v430_v36 = vpop.permute.xlu1 %429  ;;  %v512_v37 = vld [vmem:[#allocation4 + $0xc] sm:$0xf]  ;;  %v752_v40 = vmul.f32 %v1634_v35, %v1626_v18 }
 0x3ec   : > { %432 = vst.msk [vmem:[%s347_s8] sm:$0xff] %vm384_vm1, %v430_v36  ;;  %v901_v38 = vsel %vm761_vm5, %v512_v37, 0  ;;  %1483 = vmatprep.mubr.msk.bf16.mxu0 %vm1877_vm0, %v1876_v0 }
 0x3ed   : > { %1482 = vmatpush3.bf16.msra.mxu0 %v901_v38  ;;  %v756_v45 = vpack.c.bf16 %v752_v40, %v752_v40 }
 0x3ee   : > { %v1636_v39 = vpop.eup %1635  ;;  %1493 = vmatprep.subr.bf16.mxu0 %v1876_v0 }
 0x3ef   : > { %v753_v41 = vmul.f32 %v1636_v39, %v1628_v22 }
 0x3f0   : > { %v511_v42 = vld [vmem:[#allocation4 + $0x8] sm:$0xf] }
 0x3f1   : > { %v855_v43 = vsel %vm761_vm5, %v511_v42, 0  ;;  %v757_v44 = vpack.c.bf16 %v753_v41, %v753_v41 }
 0x3f2   : > { %1476 = vmatpush3.bf16.msra.mxu1 %v855_v43 }
 0x3f3   : > { %1487 = vmatprep.subr.bf16.mxu1 %v1876_v0  ;;  %1484 = vmatmul.mubr.msk.bf16.vlgmr.msra.gmra.mrb[16].mxu0 %vm513_vm3, %v757_v44 }
 0x3f4   : > { %1495 = vmatprep.mubr.msk.bf16.mxu0 %vm1877_vm0, %v1876_v0  ;;  %1494 = vmatpush3.bf16.msra.mxu0 %v998_v47 }
 0x3f5   : > { %1478 = vmatmul.mubr.msk.bf16.vlgmr.msra.gmra.mrb[12].mxu1 %vm513_vm3, %v756_v45  ;;  %1505 = vmatprep.subr.bf16.mxu0 %v1876_v0 }
 0x3f6   : > { %1489 = vmatprep.mubr.msk.bf16.mxu1 %vm1877_vm0, %v1876_v0  ;;  %1488 = vmatpush3.bf16.msra.mxu1 %v952_v49 }
 0x3f7   : > { %1499 = vmatprep.subr.bf16.mxu1 %v1876_v0 }
 0x4ba   : > { %v799_v51 = vpop.f32.mrb[8].mxu1 }
 0x4bb   : > { %v943_v52 = vpack.c.bf16 %v799_v51, %v799_v51  ;;  %v1467_v53 = vpop.f32.mrb[9].mxu1 }
 0x4bc   : > { %v802_v55 = vpop.f32.mrb[10].mxu1 }
 0x4bd   : > { %v1468_v57 = vpop.f32.mrb[11].mxu1  ;;  %1496 = vmatmul.mubr.msk.bf16.vlgmr.msra.gmra.mrb[20].mxu0 %vm513_vm3, %v943_v52 }
 0x4be   : > { %v845_v58 = vpop.f32.mrb[12].mxu0  ;;  %1506 = vmatpush3.bf16.msra.mxu0 %v1097_v54  ;;  %1507 = vmatprep.mubr.msk.bf16.mxu0 %vm1877_vm0, %v1876_v0 }
 0x4bf   : > { %v945_v59 = vpack.c.bf16 %v845_v58, %v845_v58  ;;  %v1473_v60 = vpop.f32.mrb[13].mxu0 }
 0x4c0   : > { %v848_v62 = vpop.f32.mrb[14].mxu0 }
 0x4c1   : > { %v1474_v63 = vpop.f32.mrb[15].mxu0  ;;  %1490 = vmatmul.mubr.msk.bf16.vlgmr.msra.gmra.mrb[16].mxu1 %vm513_vm3, %v945_v59 }
 0x4c2   : > { %1500 = vmatpush3.bf16.msra.mxu1 %v1047_v61  ;;  %1501 = vmatprep.mubr.msk.bf16.mxu1 %vm1877_vm0, %v1876_v0 }
 0x4c6   : > { %v937_v1 = vpop.f32.mrb[16].mxu0 }
 0x4c7   : > { %v1090_v2 = vpack.c.bf16 %v937_v1, %v937_v1  ;;  %v1485_v4 = vpop.f32.mrb[17].mxu0 }
 0x4c8   : > { %v891_v3 = vpop.f32.mrb[12].mxu1  ;;  %v940_v8 = vpop.f32.mrb[18].mxu0 }
 0x4c9   : > { %v1040_v5 = vpack.c.bf16 %v891_v3, %v891_v3  ;;  %v1479_v7 = vpop.f32.mrb[13].mxu1  ;;  %v1486_v11 = vpop.f32.mrb[19].mxu0  ;;  %1508 = vmatmul.mubr.msk.bf16.vlgmr.msra.gmra.mrb[24].mxu0 %vm513_vm3, %v1090_v2 }
 0x4ca   : > { %v894_v10 = vpop.f32.mrb[14].mxu1 }
 0x4cb   : > { %v1480_v12 = vpop.f32.mrb[15].mxu1  ;;  %1502 = vmatmul.mubr.msk.bf16.vlgmr.msra.gmra.mrb[20].mxu1 %vm513_vm3, %v1040_v5 }
 0x4cc   : > { %1736 = shalt.err (!%p1733_p1)
}
 0x4cd   : > { %s1737_s12 = scalar_lea.hbm %s2259_s23, 128  ;;  %s1741_s16 = scalar_lea.hbm %s2371_s6, 256 }
 0x4ce   : > { %p1738_p6 = scmp.ne.s32.totalorder %s2259_s23, %s1737_s12  ;;  %p1742_p4 = scmp.lt.u32.totalorder %s2259_s23, %s2371_s6 }
 0x4cf   : > { %p1743_p9 = scmp.lt.u32.totalorder %s1741_s16, %s1737_s12  ;;  %p1745_p8 = scmp.lt.u32.totalorder %s1737_s12, %s2259_s23 }
 0x4d0   : > { %p1739_p10 = pnand %p1738_p6, %p2391_p2 }
 0x4d1   : > { %p1744_p11 = por %p1743_p9, %p1742_p4 }
 0x4d2   : > { %p1740_p3 = pneg %p1739_p10 }
 0x4d3   : > { %p1746_p13 = por %p1745_p8, %p1744_p11 }
 0x4d5   : > { %p1747_p5 = pnand %p1746_p13, %p1740_p3 }
 0x4d7   : > { %1750 = shalt.err (!%p1747_p5)
}
 0x4d8   : > { %1522 = dma.vmem_to_hbm [thread:$0]  (%p2391_p2), %s1189_s22, 128, %s2259_s23, %s2267_s21  }
 0x4d9   : > { %s1199_s30 = scalar_lea.hbm %s2372_s7, %s2253_s19  ;;  %s1751_s8 = scalar_lea.vmem %s1202_s13, 128 }
 0x4da   : > { %p1752_p7 = scmp.ne.s32.totalorder %s1202_s13, %s1751_s8  ;;  %s1890_s12 = smov [#allocation14]  }
 0x4db   : > { %s1755_s10 = sshll.u32 %s1890_s12, 4  ;;  %s1756_s10 = int_to_ptr.vmem [resolvable:$false] %s1755_s10 }
 0x4dc   : > { %p1753_p12 = pnand %p1752_p7, %p2391_p2  ;;  %s1757_s16 = scalar_lea.vmem %s1756_s10, 256 }
 0x4dd   : > { %p1758_p1 = scmp.lt.s32.totalorder %s1202_s13, %s1756_s10  ;;  %p1759_p6 = scmp.lt.s32.totalorder %s1757_s16, %s1751_s8 }
 0x4de   : > { %p1754_p0 = pneg %p1753_p12 }
 0x4df   : > { %p1760_p10 = por %p1759_p6, %p1758_p1 }
 0x4e1   : > { %p1761_p3 = pnand %p1760_p10, %p1754_p0 }
 0x4e3   : > { %1764 = shalt.err (!%p1761_p3)
}
 0x4e4   : > { %s1765_s23 = scalar_lea.hbm %s1199_s30, 128  ;;  %s1769_s27 = scalar_lea.hbm %s2372_s7, 256 }
 0x4e5   : > { %p1766_p4 = scmp.ne.s32.totalorder %s1199_s30, %s1765_s23  ;;  %p1770_p8 = scmp.lt.u32.totalorder %s1199_s30, %s2372_s7 }
 0x4e6   : > { %p1771_p13 = scmp.lt.u32.totalorder %s1769_s27, %s1765_s23  ;;  %p1773_p7 = scmp.lt.u32.totalorder %s1765_s23, %s1199_s30 }
 0x4e7   : > { %p1767_p9 = pnand %p1766_p4, %p2391_p2 }
 0x4e8   : > { %p1772_p5 = por %p1771_p13, %p1770_p8 }
 0x4e9   : > { %p1768_p11 = pneg %p1767_p9 }
 0x4ea   : > { %p1774_p12 = por %p1773_p7, %p1772_p5 }
 0x4ec   : > { %p1775_p0 = pnand %p1774_p12, %p1768_p11 }
 0x4ee   : > { %1778 = shalt.err (!%p1775_p0)
}
 0x4ef   : > { %1523 = dma.vmem_to_hbm [thread:$0]  (%p2391_p2), %s1202_s13, 128, %s1199_s30, %s2267_s21   ;;  %v1393_v27 = vld [vmem:[%s2369_s4] ss:$0 sm:$0xff] }
 0x4f0   : > { %s340_s30 = scalar_lea.vmem [#allocation11], %s2209_s11  ;;  %s2313_s16 = scalar_lea.hbm %s2370_s5, %s2253_s19 }
 0x4f1   : > { %s1175_s8 = sshll.u32 %s340_s30, 4  ;;  %s1151_s23 = scalar_lea.sflag [#allocation7], %s2115_s20  ;;  %s2315_s8 = int_to_ptr.vmem [resolvable:$true] %s1175_s8 }
 0x4f2   : > { %s1779_s22 = scalar_lea.vmem %s2315_s8, 128  ;;  %s1891_s11 = smov [#allocation11]  }
 0x4f3   : > { %p1780_p1 = scmp.ne.s32.totalorder %s2315_s8, %s1779_s22  ;;  %s1783_s15 = sshll.u32 %s1891_s11, 4  ;;  %s1784_s15 = int_to_ptr.vmem [resolvable:$false] %s1783_s15 }
 0x4f4   : > { %s1785_s27 = scalar_lea.vmem %s1784_s15, 256  ;;  %p1786_p3 = scmp.lt.s32.totalorder %s2315_s8, %s1784_s15 }
 0x4f5   : > { %p1781_p6 = pnand %p1780_p1, %p2391_p2  ;;  %p1787_p4 = scmp.lt.s32.totalorder %s1785_s27, %s1779_s22 }
 0x4f7   : > { %p1782_p10 = pneg %p1781_p6  ;;  %p1788_p9 = por %p1787_p4, %p1786_p3 }
 0x4f9   : > { %p1789_p11 = pnand %p1788_p9, %p1782_p10 }
 0x590   : > { %v1034_v0 = vpop.f32.mrb[20].mxu0 }
 0x591   : > { %v1497_v13 = vpop.f32.mrb[21].mxu0 }
 0x592   : > { %v1037_v14 = vpop.f32.mrb[22].mxu0 }
 0x593   : > { %v1498_v15 = vpop.f32.mrb[23].mxu0 }
 0x594   : > { %v988_v16 = vpop.f32.mrb[16].mxu1 }
 0x595   : > { %v1035_v17 = vadd.f32 %v1034_v0, %v988_v16  ;;  %v1491_v18 = vpop.f32.mrb[17].mxu1 }
 0x596   : > { %v991_v19 = vpop.f32.mrb[18].mxu1 }
 0x597   : > { %v1492_v20 = vpop.f32.mrb[19].mxu1 }
 0x59c   : > { %v1133_v21 = vpop.f32.mrb[24].mxu0 }
 0x59d   : > { %v1509_v23 = vpop.f32.mrb[25].mxu0 }
 0x59e   : > { %v1083_v22 = vpop.f32.mrb[20].mxu1  ;;  %v1136_v26 = vpop.f32.mrb[26].mxu0 }
 0x59f   : > { %v1089_v24 = vadd.f32 %v1083_v22, %v1035_v17  ;;  %v1503_v25 = vpop.f32.mrb[21].mxu1  ;;  %v1510_v29 = vpop.f32.mrb[27].mxu0 }
 0x5a0   : > { %v1086_v28 = vpop.f32.mrb[22].mxu1 }
 0x5a1   : > { %v1139_v9 = vadd.f32 %v1133_v21, %v1089_v24  ;;  %v1504_v30 = vpop.f32.mrb[23].mxu1 }
 0x5a3   : > { %v1147_v6 = vadd.f32 %v1393_v27, %v1139_v9 }
 0x5a5   : > { %1149 = vst.msk [vmem:[%s340_s30] sm:$0xff] %vm384_vm1, %v1147_v6 }
 0x5a6   : > { %1792 = shalt.err (!%p1789_p11)
}
 0x5a7   : > { %s1793_s20 = scalar_lea.hbm %s2313_s16, 128  ;;  %s1797_s9 = scalar_lea.hbm %s2370_s5, 256 }
 0x5a8   : > { %p1794_p8 = scmp.ne.s32.totalorder %s2313_s16, %s1793_s20  ;;  %p1798_p7 = scmp.lt.u32.totalorder %s2313_s16, %s2370_s5 }
 0x5a9   : > { %p1799_p12 = scmp.lt.u32.totalorder %s1797_s9, %s1793_s20  ;;  %p1801_p1 = scmp.lt.u32.totalorder %s1793_s20, %s2313_s16 }
 0x5aa   : > { %p1795_p13 = pnand %p1794_p8, %p2391_p2 }
 0x5ab   : > { %p1800_p0 = por %p1799_p12, %p1798_p7 }
 0x5ac   : > { %p1796_p5 = pneg %p1795_p13 }
 0x5ad   : > { %p1802_p6 = por %p1801_p1, %p1800_p0 }
 0x5af   : > { %p1803_p10 = pnand %p1802_p6, %p1796_p5 }
 0x5b1   : > { %1806 = shalt.err (!%p1803_p10)
}
 0x5b2   : > { %1521 = dma.vmem_to_hbm [thread:$0]  (%p2391_p2), %s2315_s8, 128, %s2313_s16, %s1151_s23  }
 0x5b3 PF: > { %s2392_s30 = sld [smem:[#allocation19_spill]]  ;;  %s1213_s12 = sand.u32 1, %s1849_s24  }
 0x5b4   : > { %p2394_p4 = scmp.ge.s32.totalorder %s1869_s29, 2  ;;  %s1214_s10 = scalar_lea.sflag [#allocation7], %s1213_s12 }
 0x5b9   : > { %p2393_p3 = scmp.ne.s32.totalorder %s2392_s30, 0 }
 0x5bb   : > { %p1539_p9 = pnand %p2394_p4, %p2393_p3 }
 0x5bd   : > { %1840 = dma.done.wait (!%p1539_p9), %s1214_s10, 128  }
 0x5be   : > { %1842 = vsyncadd (!%p1539_p9), %s1214_s10, 4294967168  ;;  %s2395_s22 = sadd.s32 4294967294, %s1869_s29  }
 0x5bf   : > { %s1222_s11 = sand.u32 1, %s2395_s22  }
 0x5c0   : > { %s1223_s15 = scalar_lea.sflag [#allocation13], %s1222_s11 }
 0x5c1   : > { %1844 = dma.done.wait (!%p1539_p9), %s1223_s15, 256  }
 0x5c2   : > { %1846 = vsyncadd (!%p1539_p9), %s1223_s15, 4294967040  ;;  %s28_s29 = sadd.s32 1, %s1869_s29   ;;  %s2396_s24 = smov %s1853_s25 }
 0x5c3   : > { %p25_p2 = scmp.ge.s32.totalorder %s28_s29, 4   ;;  %s2397_s25 = smov %s1857_s26 }
 0x5c4   : > { %s2398_s26 = smov %s2072_s17  ;;  %s2399_s27 = smov %s1865_s28 }
 0x5c5   : > { %s2400_s28 = smov %s2402_s18  ;;  %27 = sbr.rel (!%p25_p2) target bundleno = 11 (0xb), region = 141 }
 0x5cc   :  { %1237 = vsyncpa [#allocation6], 1 }
 0x5cd   :  { %1239 = vsyncpa [#allocation6 + $0x1], 1 }
 0x5ce   :  { %1240 = vsyncpa [#allocation9], 1 }
 0x5cf   :  { %1241 = vsyncpa [#allocation7], 1 }
 0x5d0   :  { %1243 = vsyncpa [#allocation7 + $0x1], 1 }
 0x5d1   :  { %1244 = vsyncpa [#allocation13], 1 }
 0x5d2   :  { %1246 = vsyncpa [#allocation13 + $0x1], 1 }

</bundles_post_ra>
